<compile_context>
chip_gen: v6e
topology: v6e:2x2x1
jax: 0.10.0
libtpu: 0.0.40
codegen_flags: <defaults>
</compile_context>

<pallas_src>
import functools

import jax
import jax.numpy as jnp
from jax.experimental import pallas as pl
from jax.experimental.pallas import tpu as pltpu

LANE = 128


def _round_up(n, m):
    return ((n + m - 1) // m) * m


def qneural_kernel(x_ref, w1_ref, b1_ref, w2_ref, b2_ref, w3_ref, b3_ref, o_ref):
    # Fully fused forward pass; every operand is lane-dense (last dim = 128).
    x = x_ref[...]
    h1 = jnp.dot(x, w1_ref[...], preferred_element_type=jnp.float32) + b1_ref[...]
    h1 = jnp.maximum(h1, 0.0).astype(w2_ref.dtype)
    h2 = jnp.dot(h1, w2_ref[...], preferred_element_type=jnp.float32) + b2_ref[...]
    h2 = jnp.maximum(h2, 0.0).astype(w3_ref.dtype)
    out = jnp.dot(h2, w3_ref[...], preferred_element_type=jnp.float32) + b3_ref[...]
    o_ref[...] = out.astype(o_ref.dtype)


def qneural_forward(x, params, *, tile_m=512, compute_dtype=jnp.float32):
    """QNeural forward via Pallas. Pads features to 128 lanes and batch to the tile."""
    w1, b1, w2, b2, w3, b3 = params
    B, in_size = x.shape
    hidden = w1.shape[1]
    out_size = w3.shape[1]

    # ---- Lane-dense padding of every feature dimension to a multiple of 128 ----
    in_p = _round_up(in_size, LANE)
    hid_p = _round_up(hidden, LANE)
    out_p = _round_up(out_size, LANE)

    x_p = jnp.pad(x, ((0, 0), (0, in_p - in_size)))
    w1_p = jnp.pad(w1, ((0, in_p - in_size), (0, hid_p - hidden)))
    b1_p = jnp.pad(b1, ((0, 0), (0, hid_p - hidden)))
    w2_p = jnp.pad(w2, ((0, hid_p - hidden), (0, hid_p - hidden)))
    b2_p = jnp.pad(b2, ((0, 0), (0, hid_p - hidden)))
    w3_p = jnp.pad(w3, ((0, hid_p - hidden), (0, out_p - out_size)))
    b3_p = jnp.pad(b3, ((0, 0), (0, out_p - out_size)))

    # ---- Batch tiling: single tile when small, else tile_m-row tiles + padding ----
    b_align = _round_up(B, 8)
    if b_align <= tile_m:
        tile_m_eff = b_align          # whole (8-aligned) batch in one grid step
        b_pad = b_align
    else:
        tile_m_eff = tile_m
        b_pad = _round_up(B, tile_m)
    if b_pad != B:
        x_p = jnp.pad(x_p, ((0, b_pad - B), (0, 0)))

    # Optional bf16 operand path (f32 accumulate) for v6e/v7x.
    if compute_dtype != jnp.float32:
        x_p = x_p.astype(compute_dtype)
        w1_p = w1_p.astype(compute_dtype)
        w2_p = w2_p.astype(compute_dtype)
        w3_p = w3_p.astype(compute_dtype)

    grid = (b_pad // tile_m_eff,)

    flops = 2 * b_pad * (in_p * hid_p + hid_p * hid_p + hid_p * out_p)
    bytes_accessed = (
        x_p.size * x_p.dtype.itemsize
        + sum(a.size * a.dtype.itemsize
              for a in (w1_p, b1_p, w2_p, b2_p, w3_p, b3_p))
        + b_pad * out_p * 4
    )

    out_padded = pl.pallas_call(
        qneural_kernel,
        out_shape=jax.ShapeDtypeStruct((b_pad, out_p), jnp.float32),
        grid_spec=pltpu.PrefetchScalarGridSpec(
            num_scalar_prefetch=0,
            grid=grid,
            in_specs=[
                pl.BlockSpec((tile_m_eff, in_p), lambda i: (i, 0)),   # x tile
                pl.BlockSpec((in_p, hid_p), lambda i: (0, 0)),        # W1 (resident)
                pl.BlockSpec((1, hid_p), lambda i: (0, 0)),           # b1
                pl.BlockSpec((hid_p, hid_p), lambda i: (0, 0)),       # W2 (resident)
                pl.BlockSpec((1, hid_p), lambda i: (0, 0)),           # b2
                pl.BlockSpec((hid_p, out_p), lambda i: (0, 0)),       # W3 (resident)
                pl.BlockSpec((1, out_p), lambda i: (0, 0)),           # b3
            ],
            out_specs=pl.BlockSpec((tile_m_eff, out_p), lambda i: (i, 0)),
        ),
        compiler_params=pltpu.CompilerParams(
            dimension_semantics=("parallel",),
        ),
        cost_estimate=pl.CostEstimate(
            flops=flops, transcendentals=0, bytes_accessed=bytes_accessed),
    )(x_p, w1_p, b1_p, w2_p, b2_p, w3_p, b3_p)

    # Slice away the zero-padded batch rows and output lanes.
    return out_padded[:B, :out_size]


def init_params(key, input_size, hidden, output_size):
    """Deterministic synthetic parameters matching nn.Linear shapes (pre-transposed)."""
    k1, k2, k3, k4, k5, k6 = jax.random.split(key, 6)
    # PyTorch nn.Linear weight is (out, in); we store the transpose (in, out).
    w1 = jax.random.normal(k1, (input_size, hidden), jnp.float32) * 0.1
    b1 = jax.random.normal(k2, (1, hidden), jnp.float32) * 0.1
    w2 = jax.random.normal(k3, (hidden, hidden), jnp.float32) * 0.1
    b2 = jax.random.normal(k4, (1, hidden), jnp.float32) * 0.1
    w3 = jax.random.normal(k5, (hidden, output_size), jnp.float32) * 0.1
    b3 = jax.random.normal(k6, (1, output_size), jnp.float32) * 0.1
    return (w1, b1, w2, b2, w3, b3)


def reference_forward(x, params):
    w1, b1, w2, b2, w3, b3 = params
    h1 = jnp.maximum(x @ w1 + b1, 0.0)
    h2 = jnp.maximum(h1 @ w2 + b2, 0.0)
    return h2 @ w3 + b3


if __name__ == "__main__":
    input_size = 32   # e.g. state dimension
    hidden = 64       # fixed by the module
    output_size = 4   # e.g. number of actions

    key = jax.random.PRNGKey(0)
    kx, kp, kx2 = jax.random.split(key, 3)
    params = init_params(kp, input_size, hidden, output_size)

    # Jit the wrapper so the padding / slicing fuse with the pallas_call.
    fwd_small = jax.jit(functools.partial(qneural_forward, tile_m=512))
    fwd_tiled = jax.jit(functools.partial(qneural_forward, tile_m=128))

    # Small-batch case: single grid step, whole batch in one lane-dense tile.
    batch = 8
    x = jax.random.normal(kx, (batch, input_size), jnp.float32)
    out = jax.block_until_ready(fwd_small(x, params))
    ref = reference_forward(x, params)
    assert out.shape == (batch, output_size)
    assert jnp.allclose(out, ref, atol=1e-4, rtol=1e-4), "mismatch vs reference (small batch)"

    # Larger, non-multiple batch: exercises multi-step grid + batch padding path.
    batch2 = 300
    x2 = jax.random.normal(kx2, (batch2, input_size), jnp.float32)
    out2 = jax.block_until_ready(fwd_tiled(x2, params))
    ref2 = reference_forward(x2, params)
    assert out2.shape == (batch2, output_size)
    assert jnp.allclose(out2, ref2, atol=1e-4, rtol=1e-4), "mismatch vs reference (tiled batch)"

    print("KERNEL_OK")
</pallas_src>

<mosaic_0001>
module attributes {stable_mosaic.version = 11 : i64} {
  func.func @qneural_kernel(%arg0: i32, %arg1: memref<8x128xf32, #tpu.memory_space<vmem>>, %arg2: memref<128x128xf32, #tpu.memory_space<vmem>>, %arg3: memref<1x128xf32, #tpu.memory_space<vmem>>, %arg4: memref<128x128xf32, #tpu.memory_space<vmem>>, %arg5: memref<1x128xf32, #tpu.memory_space<vmem>>, %arg6: memref<128x128xf32, #tpu.memory_space<vmem>>, %arg7: memref<1x128xf32, #tpu.memory_space<vmem>>, %arg8: memref<8x128xf32, #tpu.memory_space<vmem>>) attributes {dimension_semantics = [#tpu.dimension_semantics<parallel>], iteration_bounds = array<i64: 1>, scalar_prefetch = 0 : i64, scratch_operands = 0 : i64, tpu.core_type = #tpu.core_type<tc>, window_params = [{transform_indices = @transform_0, window_bounds = array<i64: 8, 128>}, {pipeline_mode = #tpu.pipeline_mode<synchronous>, transform_indices = @transform_1, window_bounds = array<i64: 128, 128>}, {pipeline_mode = #tpu.pipeline_mode<synchronous>, transform_indices = @transform_2, window_bounds = array<i64: 1, 128>}, {pipeline_mode = #tpu.pipeline_mode<synchronous>, transform_indices = @transform_3, window_bounds = array<i64: 128, 128>}, {pipeline_mode = #tpu.pipeline_mode<synchronous>, transform_indices = @transform_4, window_bounds = array<i64: 1, 128>}, {pipeline_mode = #tpu.pipeline_mode<synchronous>, transform_indices = @transform_5, window_bounds = array<i64: 128, 128>}, {pipeline_mode = #tpu.pipeline_mode<synchronous>, transform_indices = @transform_6, window_bounds = array<i64: 1, 128>}, {transform_indices = @transform_7, window_bounds = array<i64: 8, 128>}]} {
    %c0 = arith.constant 0 : index
    %c0_0 = arith.constant 0 : index
    %0 = vector.load %arg1[%c0, %c0_0] : memref<8x128xf32, #tpu.memory_space<vmem>>, vector<8x128xf32>
    %c0_1 = arith.constant 0 : index
    %c0_2 = arith.constant 0 : index
    %1 = vector.load %arg2[%c0_1, %c0_2] : memref<128x128xf32, #tpu.memory_space<vmem>>, vector<128x128xf32>
    %cst = arith.constant dense<0.000000e+00> : vector<8x128xf32>
    %2 = tpu.matmul %0, %1, %cst {dimension_numbers = #tpu.dot_dimension_numbers<[1], [0], [0], [1], [0, 0, 1, 1], [], []>} : vector<8x128xf32>, vector<128x128xf32>, vector<8x128xf32> -> vector<8x128xf32>
    %c0_3 = arith.constant 0 : index
    %c0_4 = arith.constant 0 : index
    %3 = vector.load %arg3[%c0_3, %c0_4] : memref<1x128xf32, #tpu.memory_space<vmem>>, vector<1x128xf32>
    %4 = vector.broadcast %3 : vector<1x128xf32> to vector<8x128xf32>
    %5 = arith.addf %2, %4 : vector<8x128xf32>
    %cst_5 = arith.constant 0.000000e+00 : f32
    %6 = vector.broadcast %cst_5 : f32 to vector<8x128xf32>
    %7 = arith.maximumf %5, %6 : vector<8x128xf32>
    %c0_6 = arith.constant 0 : index
    %c0_7 = arith.constant 0 : index
    %8 = vector.load %arg4[%c0_6, %c0_7] : memref<128x128xf32, #tpu.memory_space<vmem>>, vector<128x128xf32>
    %cst_8 = arith.constant dense<0.000000e+00> : vector<8x128xf32>
    %9 = tpu.matmul %7, %8, %cst_8 {dimension_numbers = #tpu.dot_dimension_numbers<[1], [0], [0], [1], [0, 0, 1, 1], [], []>} : vector<8x128xf32>, vector<128x128xf32>, vector<8x128xf32> -> vector<8x128xf32>
    %c0_9 = arith.constant 0 : index
    %c0_10 = arith.constant 0 : index
    %10 = vector.load %arg5[%c0_9, %c0_10] : memref<1x128xf32, #tpu.memory_space<vmem>>, vector<1x128xf32>
    %11 = vector.broadcast %10 : vector<1x128xf32> to vector<8x128xf32>
    %12 = arith.addf %9, %11 : vector<8x128xf32>
    %cst_11 = arith.constant 0.000000e+00 : f32
    %13 = vector.broadcast %cst_11 : f32 to vector<8x128xf32>
    %14 = arith.maximumf %12, %13 : vector<8x128xf32>
    %c0_12 = arith.constant 0 : index
    %c0_13 = arith.constant 0 : index
    %15 = vector.load %arg6[%c0_12, %c0_13] : memref<128x128xf32, #tpu.memory_space<vmem>>, vector<128x128xf32>
    %cst_14 = arith.constant dense<0.000000e+00> : vector<8x128xf32>
    %16 = tpu.matmul %14, %15, %cst_14 {dimension_numbers = #tpu.dot_dimension_numbers<[1], [0], [0], [1], [0, 0, 1, 1], [], []>} : vector<8x128xf32>, vector<128x128xf32>, vector<8x128xf32> -> vector<8x128xf32>
    %c0_15 = arith.constant 0 : index
    %c0_16 = arith.constant 0 : index
    %17 = vector.load %arg7[%c0_15, %c0_16] : memref<1x128xf32, #tpu.memory_space<vmem>>, vector<1x128xf32>
    %18 = vector.broadcast %17 : vector<1x128xf32> to vector<8x128xf32>
    %19 = arith.addf %16, %18 : vector<8x128xf32>
    %c0_17 = arith.constant 0 : index
    %c0_18 = arith.constant 0 : index
    %20 = vector.load %arg8[%c0_17, %c0_18] : memref<8x128xf32, #tpu.memory_space<vmem>>, vector<8x128xf32>
    tpu.vector_store %arg8[%c0_17, %c0_18], %19 {strides = array<i32>} : memref<8x128xf32, #tpu.memory_space<vmem>>, vector<8x128xf32>,
    return
  }
  func.func @transform_0(%arg0: i32) -> (i32, i32) {
    %c0_i32 = arith.constant 0 : i32
    %c0_i32_0 = arith.constant 0 : i32
    return %arg0, %c0_i32 : i32, i32
  }
  func.func @transform_1(%arg0: i32) -> (i32, i32) {
    %c0_i32 = arith.constant 0 : i32
    %c0_i32_0 = arith.constant 0 : i32
    %c0_i32_1 = arith.constant 0 : i32
    return %c0_i32, %c0_i32_0 : i32, i32
  }
  func.func @transform_2(%arg0: i32) -> (i32, i32) {
    %c0_i32 = arith.constant 0 : i32
    %c0_i32_0 = arith.constant 0 : i32
    %c0_i32_1 = arith.constant 0 : i32
    return %c0_i32, %c0_i32_0 : i32, i32
  }
  func.func @transform_3(%arg0: i32) -> (i32, i32) {
    %c0_i32 = arith.constant 0 : i32
    %c0_i32_0 = arith.constant 0 : i32
    %c0_i32_1 = arith.constant 0 : i32
    return %c0_i32, %c0_i32_0 : i32, i32
  }
  func.func @transform_4(%arg0: i32) -> (i32, i32) {
    %c0_i32 = arith.constant 0 : i32
    %c0_i32_0 = arith.constant 0 : i32
    %c0_i32_1 = arith.constant 0 : i32
    return %c0_i32, %c0_i32_0 : i32, i32
  }
  func.func @transform_5(%arg0: i32) -> (i32, i32) {
    %c0_i32 = arith.constant 0 : i32
    %c0_i32_0 = arith.constant 0 : i32
    %c0_i32_1 = arith.constant 0 : i32
    return %c0_i32, %c0_i32_0 : i32, i32
  }
  func.func @transform_6(%arg0: i32) -> (i32, i32) {
    %c0_i32 = arith.constant 0 : i32
    %c0_i32_0 = arith.constant 0 : i32
    %c0_i32_1 = arith.constant 0 : i32
    return %c0_i32, %c0_i32_0 : i32, i32
  }
  func.func @transform_7(%arg0: i32) -> (i32, i32) {
    %c0_i32 = arith.constant 0 : i32
    %c0_i32_0 = arith.constant 0 : i32
    return %arg0, %c0_i32 : i32, i32
  }
}

</mosaic_0001>

<bundles_post_ra>
// kernel: qneural_forward.1
= control target key start
LH: loop header
LB: loop body
LE: loop exit
PB: predicated region body
PF: predicated region fallthrough
CT: control target
= control target key end

     0   :  { %v474_v0 = vmov 0.0   ;;  %vm475_vm0 = vmmov 0   ;;  %s729_s1 = inlined_call_operand.vmem [shape: f32[128,128], index: 1, kind: input, shape index: {}]   ;;  %s730_s3 = inlined_call_operand.vmem [shape: f32[128,128], index: 3, kind: input, shape index: {}]   ;;  %s731_s0 = inlined_call_operand.vmem [shape: f32[8,128], index: 0, kind: input, shape index: {}]   ;;  %s732_s5 = inlined_call_operand.vmem [shape: f32[128,128], index: 5, kind: input, shape index: {}]   ;;  %s733_s2 = inlined_call_operand.vmem [shape: f32[1,128], index: 2, kind: input, shape index: {}]   ;;  %s734_s4 = inlined_call_operand.vmem [shape: f32[1,128], index: 4, kind: input, shape index: {}]   ;;  %s735_s6 = inlined_call_operand.vmem [shape: f32[1,128], index: 6, kind: input, shape index: {}]   ;;  %s736_s7 = inlined_call_operand.vmem [shape: f32[8,128], index: 7, kind: output, shape index: {}]  }
   0x1   :  { %367 = vmatprep.subr.mxu0 %v474_v0  ;;  %v42_v1 = vld [vmem:[%s729_s1 + $0x78] sm:$0xff]  ;;  %v41_v2 = vld [vmem:[%s729_s1 + $0x70] sm:$0xff]  ;;  %399 = vmatprep.mubr.msk.f32.mxu0 %vm475_vm0, %v474_v0  ;;  %v40_v3 = vld [vmem:[%s729_s1 + $0x68] sm:$0xff] }
   0x2   :  { %368 = vmatpush3.msra.mxu0 %v42_v1  ;;  %402 = vmatprep.subr.mxu1 %v474_v0  ;;  %v39_v4 = vld [vmem:[%s729_s1 + $0x60] sm:$0xff]  ;;  %v136_v5 = vld [vmem:[%s730_s3 + $0x78] sm:$0xff]  ;;  %v135_v7 = vld [vmem:[%s730_s3 + $0x70] sm:$0xff] }
   0x3   :  { %369 = vmatprep.subr.mxu0 %v474_v0  ;;  %434 = vmatprep.mubr.msk.f32.mxu1 %vm475_vm0, %v474_v0  ;;  %v38_v6 = vld [vmem:[%s729_s1 + $0x58] sm:$0xff]  ;;  %v134_v8 = vld [vmem:[%s730_s3 + $0x68] sm:$0xff]  ;;  %v37_v9 = vld [vmem:[%s729_s1 + $0x50] sm:$0xff] }
   0x4   :  { %370 = vmatpush3.msra.mxu0 %v41_v2  ;;  %403 = vmatpush3.msra.mxu1 %v136_v5  ;;  %v133_v10 = vld [vmem:[%s730_s3 + $0x60] sm:$0xff]  ;;  %v36_v11 = vld [vmem:[%s729_s1 + $0x48] sm:$0xff]  ;;  %v132_v12 = vld [vmem:[%s730_s3 + $0x58] sm:$0xff] }
   0x5   :  { %371 = vmatprep.subr.mxu0 %v474_v0  ;;  %404 = vmatprep.subr.mxu1 %v474_v0  ;;  %v35_v13 = vld [vmem:[%s729_s1 + $0x40] sm:$0xff]  ;;  %v131_v14 = vld [vmem:[%s730_s3 + $0x50] sm:$0xff]  ;;  %v34_v15 = vld [vmem:[%s729_s1 + $0x38] sm:$0xff] }
   0x6   :  { %372 = vmatpush3.msra.mxu0 %v40_v3  ;;  %405 = vmatpush3.msra.mxu1 %v135_v7  ;;  %v130_v16 = vld [vmem:[%s730_s3 + $0x48] sm:$0xff]  ;;  %v33_v17 = vld [vmem:[%s729_s1 + $0x30] sm:$0xff]  ;;  %v129_v18 = vld [vmem:[%s730_s3 + $0x40] sm:$0xff] }
   0x7   :  { %373 = vmatprep.subr.mxu0 %v474_v0  ;;  %406 = vmatprep.subr.mxu1 %v474_v0  ;;  %v32_v19 = vld [vmem:[%s729_s1 + $0x28] sm:$0xff]  ;;  %v128_v20 = vld [vmem:[%s730_s3 + $0x38] sm:$0xff]  ;;  %v31_v21 = vld [vmem:[%s729_s1 + $0x20] sm:$0xff] }
   0x8   :  { %374 = vmatpush3.msra.mxu0 %v39_v4  ;;  %407 = vmatpush3.msra.mxu1 %v134_v8  ;;  %v127_v22 = vld [vmem:[%s730_s3 + $0x30] sm:$0xff]  ;;  %v30_v23 = vld [vmem:[%s729_s1 + $0x18] sm:$0xff]  ;;  %v126_v24 = vld [vmem:[%s730_s3 + $0x28] sm:$0xff] }
   0x9   :  { %375 = vmatprep.subr.mxu0 %v474_v0  ;;  %408 = vmatprep.subr.mxu1 %v474_v0  ;;  %v29_v25 = vld [vmem:[%s729_s1 + $0x10] sm:$0xff]  ;;  %v125_v26 = vld [vmem:[%s730_s3 + $0x20] sm:$0xff]  ;;  %v28_v27 = vld [vmem:[%s729_s1 + $0x8] sm:$0xff] }
   0xa   :  { %376 = vmatpush3.msra.mxu0 %v38_v6  ;;  %409 = vmatpush3.msra.mxu1 %v133_v10  ;;  %v124_v28 = vld [vmem:[%s730_s3 + $0x18] sm:$0xff]  ;;  %v27_v29 = vld [vmem:[%s729_s1] sm:$0xff]  ;;  %v123_v31 = vld [vmem:[%s730_s3 + $0x10] sm:$0xff] }
   0xb   :  { %377 = vmatprep.subr.mxu0 %v474_v0  ;;  %410 = vmatprep.subr.mxu1 %v474_v0  ;;  %v26_v30 = vld [vmem:[%s731_s0] sm:$0xff]  ;;  %v122_v32 = vld [vmem:[%s730_s3 + $0x8] sm:$0xff]  ;;  %v230_v34 = vld [vmem:[%s732_s5 + $0x78] sm:$0xff] }
   0xc   :  { %378 = vmatpush3.msra.mxu0 %v37_v9  ;;  %411 = vmatpush3.msra.mxu1 %v132_v12  ;;  %v121_v33 = vld [vmem:[%s730_s3] sm:$0xff]  ;;  %v229_v35 = vld [vmem:[%s732_s5 + $0x70] sm:$0xff]  ;;  %v228_v36 = vld [vmem:[%s732_s5 + $0x68] sm:$0xff] }
   0xd   :  { %379 = vmatprep.subr.mxu0 %v474_v0  ;;  %412 = vmatprep.subr.mxu1 %v474_v0  ;;  %v227_v37 = vld [vmem:[%s732_s5 + $0x60] sm:$0xff]  ;;  %v226_v38 = vld [vmem:[%s732_s5 + $0x58] sm:$0xff]  ;;  %v225_v39 = vld [vmem:[%s732_s5 + $0x50] sm:$0xff] }
   0xe   :  { %380 = vmatpush3.msra.mxu0 %v36_v11  ;;  %413 = vmatpush3.msra.mxu1 %v131_v14  ;;  %v224_v40 = vld [vmem:[%s732_s5 + $0x48] sm:$0xff]  ;;  %v223_v41 = vld [vmem:[%s732_s5 + $0x40] sm:$0xff]  ;;  %v222_v42 = vld [vmem:[%s732_s5 + $0x38] sm:$0xff] }
   0xf   :  { %381 = vmatprep.subr.mxu0 %v474_v0  ;;  %414 = vmatprep.subr.mxu1 %v474_v0  ;;  %v221_v43 = vld [vmem:[%s732_s5 + $0x30] sm:$0xff]  ;;  %v220_v44 = vld [vmem:[%s732_s5 + $0x28] sm:$0xff]  ;;  %v219_v45 = vld [vmem:[%s732_s5 + $0x20] sm:$0xff] }
  0x10   :  { %382 = vmatpush3.msra.mxu0 %v35_v13  ;;  %415 = vmatpush3.msra.mxu1 %v130_v16  ;;  %v218_v46 = vld [vmem:[%s732_s5 + $0x18] sm:$0xff]  ;;  %v313_v47 = vld [vmem:[%s733_s2] ss:$0 sm:$0xff]  ;;  %v217_v52 = vld [vmem:[%s732_s5 + $0x10] sm:$0xff] }
  0x11   :  { %383 = vmatprep.subr.mxu0 %v474_v0  ;;  %416 = vmatprep.subr.mxu1 %v474_v0  ;;  %v216_v53 = vld [vmem:[%s732_s5 + $0x8] sm:$0xff]  ;;  %v215_v54 = vld [vmem:[%s732_s5] sm:$0xff] }
  0x12   :  { %384 = vmatpush3.msra.mxu0 %v34_v15  ;;  %417 = vmatpush3.msra.mxu1 %v129_v18  ;;  %v314_v55 = vld [vmem:[%s734_s4] ss:$0 sm:$0xff] }
  0x13   :  { %385 = vmatprep.subr.mxu0 %v474_v0  ;;  %418 = vmatprep.subr.mxu1 %v474_v0  ;;  %v315_v60 = vld [vmem:[%s735_s6] ss:$0 sm:$0xff] }
  0x14   :  { %386 = vmatpush3.msra.mxu0 %v33_v17  ;;  %419 = vmatpush3.msra.mxu1 %v128_v20 }
  0x15   :  { %387 = vmatprep.subr.mxu0 %v474_v0  ;;  %420 = vmatprep.subr.mxu1 %v474_v0 }
  0x16   :  { %388 = vmatpush3.msra.mxu0 %v32_v19  ;;  %421 = vmatpush3.msra.mxu1 %v127_v22 }
  0x17   :  { %389 = vmatprep.subr.mxu0 %v474_v0  ;;  %422 = vmatprep.subr.mxu1 %v474_v0 }
  0x18   :  { %390 = vmatpush3.msra.mxu0 %v31_v21  ;;  %423 = vmatpush3.msra.mxu1 %v126_v24 }
  0x19   :  { %391 = vmatprep.subr.mxu0 %v474_v0  ;;  %424 = vmatprep.subr.mxu1 %v474_v0 }
  0x1a   :  { %392 = vmatpush3.msra.mxu0 %v30_v23  ;;  %425 = vmatpush3.msra.mxu1 %v125_v26 }
  0x1b   :  { %393 = vmatprep.subr.mxu0 %v474_v0  ;;  %426 = vmatprep.subr.mxu1 %v474_v0 }
  0x1c   :  { %394 = vmatpush3.msra.mxu0 %v29_v25  ;;  %427 = vmatpush3.msra.mxu1 %v124_v28 }
  0x1d   :  { %395 = vmatprep.subr.mxu0 %v474_v0  ;;  %428 = vmatprep.subr.mxu1 %v474_v0 }
  0x1e   :  { %396 = vmatpush3.msra.mxu0 %v28_v27  ;;  %429 = vmatpush3.msra.mxu1 %v123_v31 }
  0x1f   :  { %397 = vmatprep.subr.mxu0 %v474_v0  ;;  %430 = vmatprep.subr.mxu1 %v474_v0 }
  0x20   :  { %398 = vmatpush3.msra.mxu0 %v27_v29  ;;  %431 = vmatpush3.msra.mxu1 %v122_v32 }
  0x21   :  { %400 = vmatmul.mubr.f32.vlgmr.msra.gmra.mxu0 %v26_v30  ;;  %437 = vmatprep.subr.mxu0 %v474_v0 }
  0x22   :  { %469 = vmatprep.mubr.msk.f32.mxu0 %vm475_vm0, %v474_v0  ;;  %432 = vmatprep.subr.mxu1 %v474_v0 }
  0x23   :  { %433 = vmatpush3.msra.mxu1 %v121_v33  ;;  %438 = vmatpush3.msra.mxu0 %v230_v34 }
  0x24   :  { %439 = vmatprep.subr.mxu0 %v474_v0 }
  0x25   :  { %440 = vmatpush3.msra.mxu0 %v229_v35 }
  0x26   :  { %441 = vmatprep.subr.mxu0 %v474_v0 }
  0x27   :  { %442 = vmatpush3.msra.mxu0 %v228_v36 }
  0x28   :  { %443 = vmatprep.subr.mxu0 %v474_v0 }
  0x29   :  { %444 = vmatpush3.msra.mxu0 %v227_v37 }
  0x2a   :  { %445 = vmatprep.subr.mxu0 %v474_v0 }
  0x2b   :  { %446 = vmatpush3.msra.mxu0 %v226_v38 }
  0x2c   :  { %447 = vmatprep.subr.mxu0 %v474_v0 }
  0x2d   :  { %448 = vmatpush3.msra.mxu0 %v225_v39 }
  0x2e   :  { %449 = vmatprep.subr.mxu0 %v474_v0 }
  0x2f   :  { %450 = vmatpush3.msra.mxu0 %v224_v40 }
  0x30   :  { %451 = vmatprep.subr.mxu0 %v474_v0 }
  0x31   :  { %452 = vmatpush3.msra.mxu0 %v223_v41 }
  0x32   :  { %453 = vmatprep.subr.mxu0 %v474_v0 }
  0x33   :  { %454 = vmatpush3.msra.mxu0 %v222_v42 }
  0x34   :  { %455 = vmatprep.subr.mxu0 %v474_v0 }
  0x35   :  { %456 = vmatpush3.msra.mxu0 %v221_v43 }
  0x36   :  { %457 = vmatprep.subr.mxu0 %v474_v0 }
  0x37   :  { %458 = vmatpush3.msra.mxu0 %v220_v44 }
  0x38   :  { %459 = vmatprep.subr.mxu0 %v474_v0 }
  0x39   :  { %460 = vmatpush3.msra.mxu0 %v219_v45 }
  0x3a   :  { %461 = vmatprep.subr.mxu0 %v474_v0 }
  0x3b   :  { %462 = vmatpush3.msra.mxu0 %v218_v46 }
  0x3c   :  { %463 = vmatprep.subr.mxu0 %v474_v0 }
  0x3d   :  { %464 = vmatpush3.msra.mxu0 %v217_v52 }
  0x3e   :  { %465 = vmatprep.subr.mxu0 %v474_v0 }
  0x3f   :  { %466 = vmatpush3.msra.mxu0 %v216_v53 }
  0x40   :  { %467 = vmatprep.subr.mxu0 %v474_v0 }
  0x41   :  { %468 = vmatpush3.msra.mxu0 %v215_v54 }
  0xe1   :  { %v116_v48 = vpop.f32.mrf.mxu0 }
  0xe2   :  { %v117_v49 = vadd.f32 %v313_v47, %v116_v48 }
  0xe3   :  { %v401_v50 = vpop.f32.mrf.mxu0 }
  0xe4   :  { %v120_v51 = vmax.f32 %v117_v49, 0.0 }
  0xe6   :  { %435 = vmatmul.mubr.f32.vlgmr.msra.gmra.mxu1 %v120_v51 }
 0x1a6   :  { %v210_v56 = vpop.f32.mrf.mxu1 }
 0x1a7   :  { %v211_v57 = vadd.f32 %v314_v55, %v210_v56 }
 0x1a8   :  { %v436_v58 = vpop.f32.mrf.mxu1 }
 0x1a9   :  { %v214_v59 = vmax.f32 %v211_v57, 0.0 }
 0x1ab   :  { %470 = vmatmul.mubr.f32.vlgmr.msra.gmra.mxu0 %v214_v59 }
 0x26b   :  { %v304_v61 = vpop.f32.mrf.mxu0 }
 0x26c   :  { %v305_v62 = vadd.f32 %v315_v60, %v304_v61 }
 0x26d   :  { %v471_v63 = vpop.f32.mrf.mxu0 }
 0x26e   :  { %308 = vst [vmem:[%s736_s7] sm:$0xff] %v305_v62 }

</bundles_post_ra>
